<compile_context>
chip_gen: v6e
topology: v6e:2x2x1
jax: 0.10.0
libtpu: 0.0.40
codegen_flags: <defaults>
</compile_context>

<pallas_src>
import functools

import jax
import jax.numpy as jnp
from jax.experimental import pallas as pl
from jax.experimental.pallas import tpu as pltpu

IN_DIM = 256
HID = 128


# ----------------------------------------------------------------------------
# Core cell math (shared by the single-step and fused-sequence kernels)
# ----------------------------------------------------------------------------
def _cell_compute(s_t1_f32, x, wf_ref, b1_ref, b3_ref, b4_ref, w2_ref, b2_ref):
    """One RGNCell step. s_t1_f32 is (TB,128) f32; x is (TB,256) any dtype."""
    # In-kernel cast to the (bf16) weight dtype: full-rate MXU, no extra HBM.
    xw = x.astype(wf_ref.dtype)

    # One fused MXU launch for dense1 / dense3 / dense4 / dense5 (N = 512).
    pre = jnp.dot(xw, wf_ref[...], preferred_element_type=jnp.float32)

    # Per-slab bias adds (128-lane-aligned slices); dense5 has no bias.
    pre_r = pre[:, 0 * HID:1 * HID] + b1_ref[...]
    pre_i = pre[:, 1 * HID:2 * HID] + b3_ref[...]
    pre_g = pre[:, 2 * HID:3 * HID] + b4_ref[...]
    pre_d5 = pre[:, 3 * HID:4 * HID]

    # r_t = relu(dense1(x_t)); m_t = tanh(dense2(r_t))
    r_t = jnp.maximum(pre_r, 0.0)
    m_t = jnp.tanh(
        jnp.dot(r_t.astype(w2_ref.dtype), w2_ref[...],
                preferred_element_type=jnp.float32) + b2_ref[...])

    # forget = m_t * s_t1 ; read = sigmoid(dense3(x)) * tanh(dense4(x))
    forget = m_t * s_t1_f32
    i_t = jax.nn.sigmoid(pre_i)
    g_t = jnp.tanh(pre_g)
    read = i_t * g_t
    # y_t = relu(forget + read) ; s_t = relu(relu(dense5(x)) + y_t)
    y_t = jnp.maximum(forget + read, 0.0)
    d5 = jnp.maximum(pre_d5, 0.0)
    return jnp.maximum(d5 + y_t, 0.0)


def rgn_cell_kernel(s_ref, x_ref, wf_ref, b1_ref, b3_ref, b4_ref,
                    w2_ref, b2_ref, out_ref):
    s_t = _cell_compute(s_ref[...].astype(jnp.float32), x_ref[...],
                        wf_ref, b1_ref, b3_ref, b4_ref, w2_ref, b2_ref)
    out_ref[...] = s_t.astype(out_ref.dtype)


def rgn_seq_kernel(s0_ref, x_ref, wf_ref, b1_ref, b3_ref, b4_ref,
                   w2_ref, b2_ref, out_ref, s_scr):
    t = pl.program_id(0)

    @pl.when(t == 0)
    def _():
        s_scr[...] = s0_ref[...].astype(jnp.float32)

    s_t = _cell_compute(s_scr[...], x_ref[...],
                        wf_ref, b1_ref, b3_ref, b4_ref, w2_ref, b2_ref)
    s_scr[...] = s_t
    out_ref[...] = s_t.astype(out_ref.dtype)


# ----------------------------------------------------------------------------
# Parameter packing
# ----------------------------------------------------------------------------
def pack_params(params, dot_dtype=jnp.bfloat16):
    """Fuse the four x-dependent linears into one (256, 512) matmul.

    Fused output column order: [dense1 | dense3 | dense4 | dense5].
    Weights are cast to `dot_dtype` (bf16 by default, for MXU rate on
    v5e/v6e/v7x); biases stay f32 and are added post-accumulation.
    Returns (w_fused, b1, b3, b4, w2, b2) with biases shaped (1, 128).
    """
    (w1, b1, w2, b2, w3, b3, w4, b4, w5) = params
    w_fused = jnp.concatenate([w1, w3, w4, w5], axis=1)          # (256, 512)
    if dot_dtype is not None:
        w_fused = w_fused.astype(dot_dtype)
        w2 = w2.astype(dot_dtype)
    as_row = lambda b: b.reshape(1, HID).astype(jnp.float32)
    return (w_fused, as_row(b1), as_row(b3), as_row(b4), w2, as_row(b2))


def _default_batch_tile(B):
    # Small batches: single step (no pointless per-step overhead).
    if B <= 128:
        return B
    # Mid-size batches: >= 2 grid steps so v7x's second TensorCore gets work.
    if B <= 1024:
        return ((pl.cdiv(B, 2) + 7) // 8) * 8
    # Large batches: fixed 512-row tiles (grid=cdiv masks any ragged tail).
    # 512 keeps the footprint well under v5e's 16 MiB scoped VMEM default;
    # v6e/v7x could go to 1024 but the per-step overhead is already < ~10%.
    return 512


# ----------------------------------------------------------------------------
# Wrappers
# ----------------------------------------------------------------------------
@functools.partial(jax.jit, static_argnames=("batch_tile",))
def rgn_cell(s_t1, x_t, packed_params, *, batch_tile=None):
    """Single RGNCell step. Ragged B handled via cdiv grid + masked tail."""
    B = x_t.shape[0]
    if batch_tile is None:
        batch_tile = _default_batch_tile(B)
    batch_tile = min(batch_tile, B)
    grid = (pl.cdiv(B, batch_tile),)

    w_fused, b1, b3, b4, w2, b2 = packed_params
    const = lambda shape: pl.BlockSpec(shape, lambda i: (0, 0))

    return pl.pallas_call(
        rgn_cell_kernel,
        out_shape=jax.ShapeDtypeStruct((B, HID), s_t1.dtype),
        grid=grid,
        in_specs=[
            pl.BlockSpec((batch_tile, HID), lambda i: (i, 0)),     # s_t1
            pl.BlockSpec((batch_tile, IN_DIM), lambda i: (i, 0)),  # x_t
            const((IN_DIM, 4 * HID)),                              # fused W
            const((1, HID)),                                       # b1
            const((1, HID)),                                       # b3
            const((1, HID)),                                       # b4
            const((HID, HID)),                                     # dense2 W
            const((1, HID)),                                       # dense2 b
        ],
        out_specs=pl.BlockSpec((batch_tile, HID), lambda i: (i, 0)),
        compiler_params=pltpu.CompilerParams(
            dimension_semantics=("parallel",)),
    )(s_t1, x_t, w_fused, b1, b3, b4, w2, b2)


@jax.jit
def rgn_cell_sequence(s0, x_seq, packed_params):
    """Fused time loop: x_seq is (T, B, 256); returns all states (T, B, 128).

    One pallas_call, grid=(T,): weights are DMA'd to VMEM once and stay
    resident, the state is carried in a VMEM scratch, and x_t / s_t tiles are
    pipelined across steps — avoiding per-timestep launch + weight re-fetch.
    """
    T, B, _ = x_seq.shape
    w_fused, b1, b3, b4, w2, b2 = packed_params
    const = lambda shape: pl.BlockSpec(shape, lambda t: (0, 0))

    # TODO(synk): for very large B, add a second (parallel) batch-tile grid
    # axis with one state scratch per tile; CMU-MOSI batches are small.
    return pl.pallas_call(
        rgn_seq_kernel,
        out_shape=jax.ShapeDtypeStruct((T, B, HID), s0.dtype),
        grid=(T,),
        in_specs=[
            pl.BlockSpec((B, HID), lambda t: (0, 0)),              # s0
            pl.BlockSpec((None, B, IN_DIM), lambda t: (t, 0, 0)),  # x_t slice
            const((IN_DIM, 4 * HID)),                              # fused W
            const((1, HID)), const((1, HID)), const((1, HID)),     # b1,b3,b4
            const((HID, HID)), const((1, HID)),                    # W2, b2
        ],
        out_specs=pl.BlockSpec((None, B, HID), lambda t: (t, 0, 0)),
        scratch_shapes=[pltpu.VMEM((B, HID), jnp.float32)],        # carried s_t
        compiler_params=pltpu.CompilerParams(
            dimension_semantics=("arbitrary",)),                   # sequential carry
    )(s0, x_seq, w_fused, b1, b3, b4, w2, b2)


# ----------------------------------------------------------------------------
# Pure-JAX reference + synthetic init
# ----------------------------------------------------------------------------
def rgn_cell_ref(s_t1, x_t, params):
    (w1, b1, w2, b2, w3, b3, w4, b4, w5) = params
    r_t = jax.nn.relu(x_t @ w1 + b1)
    m_t = jnp.tanh(r_t @ w2 + b2)
    forget = m_t * s_t1
    i_t = jax.nn.sigmoid(x_t @ w3 + b3)
    g_t = jnp.tanh(x_t @ w4 + b4)
    read = i_t * g_t
    y_t = jax.nn.relu(forget + read)
    s_t = jax.nn.relu(jax.nn.relu(x_t @ w5) + y_t)
    return s_t


def rgn_sequence_ref(s0, x_seq, params):
    def step(s, x):
        s_new = rgn_cell_ref(s, x, params)
        return s_new, s_new
    _, ys = jax.lax.scan(step, s0, x_seq)
    return ys


def init_params(key):
    """Deterministic synthetic init (weights stored as (in, out))."""
    ks = jax.random.split(key, 9)
    si = 1.0 / jnp.sqrt(IN_DIM)
    sh = 1.0 / jnp.sqrt(HID)
    w1 = jax.random.uniform(ks[0], (IN_DIM, HID), jnp.float32, -si, si)
    b1 = jax.random.uniform(ks[1], (HID,), jnp.float32, -si, si)
    w2 = jax.random.uniform(ks[2], (HID, HID), jnp.float32, -sh, sh)
    b2 = jax.random.uniform(ks[3], (HID,), jnp.float32, -sh, sh)
    w3 = jax.random.uniform(ks[4], (IN_DIM, HID), jnp.float32, -si, si)
    b3 = jax.random.uniform(ks[5], (HID,), jnp.float32, -si, si)
    w4 = jax.random.uniform(ks[6], (IN_DIM, HID), jnp.float32, -si, si)
    b4 = jax.random.uniform(ks[7], (HID,), jnp.float32, -si, si)
    w5 = jax.random.uniform(ks[8], (IN_DIM, HID), jnp.float32, -si, si)
    return (w1, b1, w2, b2, w3, b3, w4, b4, w5)


if __name__ == "__main__":
    key = jax.random.PRNGKey(0)
    k_s, k_x, k_p, k_xs = jax.random.split(key, 4)

    B = 16
    s_t1 = jax.random.normal(k_s, (B, HID), jnp.float32)
    x_t = jax.random.normal(k_x, (B, IN_DIM), jnp.float32)
    params = init_params(k_p)
    ref = rgn_cell_ref(s_t1, x_t, params)

    # f32 weight path (tight check vs. the reference).
    packed_f32 = pack_params(params, dot_dtype=None)
    out = jax.block_until_ready(rgn_cell(s_t1, x_t, packed_f32))
    assert out.shape == (B, HID)
    assert jnp.allclose(out, ref, atol=1e-5, rtol=1e-5), "mismatch (f32 cell)"

    # Default bf16-matmul-input path (f32 accumulation, in-kernel cast).
    packed_bf16 = pack_params(params)
    out_bf16 = jax.block_until_ready(rgn_cell(s_t1, x_t, packed_bf16))
    assert out_bf16.shape == (B, HID)
    assert jnp.allclose(out_bf16, ref, atol=5e-2, rtol=5e-2), "mismatch (bf16 cell)"

    # Ragged batch: cdiv grid + masked last block.
    B2 = 20
    s2 = jax.random.normal(k_s, (B2, HID), jnp.float32)
    x2 = jax.random.normal(k_x, (B2, IN_DIM), jnp.float32)
    ref2 = rgn_cell_ref(s2, x2, params)
    out2 = jax.block_until_ready(rgn_cell(s2, x2, packed_f32, batch_tile=16))
    assert out2.shape == (B2, HID)
    assert jnp.allclose(out2, ref2, atol=1e-5, rtol=1e-5), "mismatch (ragged tail)"

    # Fused time loop (grid over T, state carried in VMEM scratch).
    T = 8
    x_seq = jax.random.normal(k_xs, (T, B, IN_DIM), jnp.float32)
    seq_ref = rgn_sequence_ref(s_t1, x_seq, params)
    seq_f32 = jax.block_until_ready(rgn_cell_sequence(s_t1, x_seq, packed_f32))
    assert seq_f32.shape == (T, B, HID)
    assert jnp.allclose(seq_f32, seq_ref, atol=1e-4, rtol=1e-4), "mismatch (f32 seq)"
    seq_bf16 = jax.block_until_ready(rgn_cell_sequence(s_t1, x_seq, packed_bf16))
    assert jnp.allclose(seq_bf16, seq_ref, atol=1e-1, rtol=1e-1), "mismatch (bf16 seq)"

    print("KERNEL_OK")
</pallas_src>

<mosaic_0001>
module attributes {stable_mosaic.version = 11 : i64} {
  func.func @rgn_cell_kernel(%arg0: i32, %arg1: memref<16x128xf32, #tpu.memory_space<vmem>>, %arg2: memref<16x256xf32, #tpu.memory_space<vmem>>, %arg3: memref<256x512xf32, #tpu.memory_space<vmem>>, %arg4: memref<1x128xf32, #tpu.memory_space<vmem>>, %arg5: memref<1x128xf32, #tpu.memory_space<vmem>>, %arg6: memref<1x128xf32, #tpu.memory_space<vmem>>, %arg7: memref<128x128xf32, #tpu.memory_space<vmem>>, %arg8: memref<1x128xf32, #tpu.memory_space<vmem>>, %arg9: memref<16x128xf32, #tpu.memory_space<vmem>>) attributes {dimension_semantics = [#tpu.dimension_semantics<parallel>], iteration_bounds = array<i64: 1>, scalar_prefetch = 0 : i64, scratch_operands = 0 : i64, tpu.core_type = #tpu.core_type<tc>, window_params = [{transform_indices = @transform_0, window_bounds = array<i64: 16, 128>}, {transform_indices = @transform_1, window_bounds = array<i64: 16, 256>}, {pipeline_mode = #tpu.pipeline_mode<synchronous>, transform_indices = @transform_2, window_bounds = array<i64: 256, 512>}, {pipeline_mode = #tpu.pipeline_mode<synchronous>, transform_indices = @transform_3, window_bounds = array<i64: 1, 128>}, {pipeline_mode = #tpu.pipeline_mode<synchronous>, transform_indices = @transform_4, window_bounds = array<i64: 1, 128>}, {pipeline_mode = #tpu.pipeline_mode<synchronous>, transform_indices = @transform_5, window_bounds = array<i64: 1, 128>}, {pipeline_mode = #tpu.pipeline_mode<synchronous>, transform_indices = @transform_6, window_bounds = array<i64: 128, 128>}, {pipeline_mode = #tpu.pipeline_mode<synchronous>, transform_indices = @transform_7, window_bounds = array<i64: 1, 128>}, {transform_indices = @transform_8, window_bounds = array<i64: 16, 128>}]} {
    %c0 = arith.constant 0 : index
    %c0_0 = arith.constant 0 : index
    %0 = vector.load %arg1[%c0, %c0_0] : memref<16x128xf32, #tpu.memory_space<vmem>>, vector<16x128xf32>
    %c0_1 = arith.constant 0 : index
    %c0_2 = arith.constant 0 : index
    %1 = vector.load %arg2[%c0_1, %c0_2] : memref<16x256xf32, #tpu.memory_space<vmem>>, vector<16x256xf32>
    %c0_3 = arith.constant 0 : index
    %c0_4 = arith.constant 0 : index
    %2 = vector.load %arg3[%c0_3, %c0_4] : memref<256x512xf32, #tpu.memory_space<vmem>>, vector<256x512xf32>
    %cst = arith.constant dense<0.000000e+00> : vector<16x512xf32>
    %3 = tpu.matmul %1, %2, %cst {dimension_numbers = #tpu.dot_dimension_numbers<[1], [0], [0], [1], [0, 0, 1, 1], [], []>} : vector<16x256xf32>, vector<256x512xf32>, vector<16x512xf32> -> vector<16x512xf32>
    %4 = vector.extract_strided_slice %3 {offsets = [0, 0], sizes = [16, 128], strides = [1, 1]} : vector<16x512xf32> to vector<16x128xf32>
    %c0_5 = arith.constant 0 : index
    %c0_6 = arith.constant 0 : index
    %5 = vector.load %arg4[%c0_5, %c0_6] : memref<1x128xf32, #tpu.memory_space<vmem>>, vector<1x128xf32>
    %6 = vector.broadcast %5 : vector<1x128xf32> to vector<16x128xf32>
    %7 = arith.addf %4, %6 : vector<16x128xf32>
    %8 = vector.extract_strided_slice %3 {offsets = [0, 128], sizes = [16, 128], strides = [1, 1]} : vector<16x512xf32> to vector<16x128xf32>
    %c0_7 = arith.constant 0 : index
    %c0_8 = arith.constant 0 : index
    %9 = vector.load %arg5[%c0_7, %c0_8] : memref<1x128xf32, #tpu.memory_space<vmem>>, vector<1x128xf32>
    %10 = vector.broadcast %9 : vector<1x128xf32> to vector<16x128xf32>
    %11 = arith.addf %8, %10 : vector<16x128xf32>
    %12 = vector.extract_strided_slice %3 {offsets = [0, 256], sizes = [16, 128], strides = [1, 1]} : vector<16x512xf32> to vector<16x128xf32>
    %c0_9 = arith.constant 0 : index
    %c0_10 = arith.constant 0 : index
    %13 = vector.load %arg6[%c0_9, %c0_10] : memref<1x128xf32, #tpu.memory_space<vmem>>, vector<1x128xf32>
    %14 = vector.broadcast %13 : vector<1x128xf32> to vector<16x128xf32>
    %15 = arith.addf %12, %14 : vector<16x128xf32>
    %16 = vector.extract_strided_slice %3 {offsets = [0, 384], sizes = [16, 128], strides = [1, 1]} : vector<16x512xf32> to vector<16x128xf32>
    %cst_11 = arith.constant 0.000000e+00 : f32
    %17 = vector.broadcast %cst_11 : f32 to vector<16x128xf32>
    %18 = arith.maximumf %7, %17 : vector<16x128xf32>
    %c0_12 = arith.constant 0 : index
    %c0_13 = arith.constant 0 : index
    %19 = vector.load %arg7[%c0_12, %c0_13] : memref<128x128xf32, #tpu.memory_space<vmem>>, vector<128x128xf32>
    %cst_14 = arith.constant dense<0.000000e+00> : vector<16x128xf32>
    %20 = tpu.matmul %18, %19, %cst_14 {dimension_numbers = #tpu.dot_dimension_numbers<[1], [0], [0], [1], [0, 0, 1, 1], [], []>} : vector<16x128xf32>, vector<128x128xf32>, vector<16x128xf32> -> vector<16x128xf32>
    %c0_15 = arith.constant 0 : index
    %c0_16 = arith.constant 0 : index
    %21 = vector.load %arg8[%c0_15, %c0_16] : memref<1x128xf32, #tpu.memory_space<vmem>>, vector<1x128xf32>
    %22 = vector.broadcast %21 : vector<1x128xf32> to vector<16x128xf32>
    %23 = arith.addf %20, %22 : vector<16x128xf32>
    %24 = math.tanh %23 : vector<16x128xf32>
    %25 = arith.mulf %24, %0 : vector<16x128xf32>
    %26 = arith.negf %11 : vector<16x128xf32>
    %27 = math.exp %26 : vector<16x128xf32>
    %cst_17 = arith.constant 1.000000e+00 : f32
    %28 = vector.broadcast %cst_17 : f32 to vector<16x128xf32>
    %29 = arith.addf %28, %27 : vector<16x128xf32>
    %30 = arith.divf %28, %29 : vector<16x128xf32>
    %31 = math.tanh %15 : vector<16x128xf32>
    %32 = arith.mulf %30, %31 : vector<16x128xf32>
    %33 = arith.addf %25, %32 : vector<16x128xf32>
    %cst_18 = arith.constant 0.000000e+00 : f32
    %34 = vector.broadcast %cst_18 : f32 to vector<16x128xf32>
    %35 = arith.maximumf %33, %34 : vector<16x128xf32>
    %cst_19 = arith.constant 0.000000e+00 : f32
    %36 = vector.broadcast %cst_19 : f32 to vector<16x128xf32>
    %37 = arith.maximumf %16, %36 : vector<16x128xf32>
    %38 = arith.addf %37, %35 : vector<16x128xf32>
    %cst_20 = arith.constant 0.000000e+00 : f32
    %39 = vector.broadcast %cst_20 : f32 to vector<16x128xf32>
    %40 = arith.maximumf %38, %39 : vector<16x128xf32>
    %c0_21 = arith.constant 0 : index
    %c0_22 = arith.constant 0 : index
    %41 = vector.load %arg9[%c0_21, %c0_22] : memref<16x128xf32, #tpu.memory_space<vmem>>, vector<16x128xf32>
    tpu.vector_store %arg9[%c0_21, %c0_22], %40 {strides = array<i32>} : memref<16x128xf32, #tpu.memory_space<vmem>>, vector<16x128xf32>,
    return
  }
  func.func @transform_0(%arg0: i32) -> (i32, i32) {
    %c0_i32 = arith.constant 0 : i32
    %c0_i32_0 = arith.constant 0 : i32
    return %arg0, %c0_i32 : i32, i32
  }
  func.func @transform_1(%arg0: i32) -> (i32, i32) {
    %c0_i32 = arith.constant 0 : i32
    %c0_i32_0 = arith.constant 0 : i32
    return %arg0, %c0_i32 : i32, i32
  }
  func.func @transform_2(%arg0: i32) -> (i32, i32) {
    %c0_i32 = arith.constant 0 : i32
    %c0_i32_0 = arith.constant 0 : i32
    %c0_i32_1 = arith.constant 0 : i32
    return %c0_i32, %c0_i32_0 : i32, i32
  }
  func.func @transform_3(%arg0: i32) -> (i32, i32) {
    %c0_i32 = arith.constant 0 : i32
    %c0_i32_0 = arith.constant 0 : i32
    %c0_i32_1 = arith.constant 0 : i32
    return %c0_i32, %c0_i32_0 : i32, i32
  }
  func.func @transform_4(%arg0: i32) -> (i32, i32) {
    %c0_i32 = arith.constant 0 : i32
    %c0_i32_0 = arith.constant 0 : i32
    %c0_i32_1 = arith.constant 0 : i32
    return %c0_i32, %c0_i32_0 : i32, i32
  }
  func.func @transform_5(%arg0: i32) -> (i32, i32) {
    %c0_i32 = arith.constant 0 : i32
    %c0_i32_0 = arith.constant 0 : i32
    %c0_i32_1 = arith.constant 0 : i32
    return %c0_i32, %c0_i32_0 : i32, i32
  }
  func.func @transform_6(%arg0: i32) -> (i32, i32) {
    %c0_i32 = arith.constant 0 : i32
    %c0_i32_0 = arith.constant 0 : i32
    %c0_i32_1 = arith.constant 0 : i32
    return %c0_i32, %c0_i32_0 : i32, i32
  }
  func.func @transform_7(%arg0: i32) -> (i32, i32) {
    %c0_i32 = arith.constant 0 : i32
    %c0_i32_0 = arith.constant 0 : i32
    %c0_i32_1 = arith.constant 0 : i32
    return %c0_i32, %c0_i32_0 : i32, i32
  }
  func.func @transform_8(%arg0: i32) -> (i32, i32) {
    %c0_i32 = arith.constant 0 : i32
    %c0_i32_0 = arith.constant 0 : i32
    return %arg0, %c0_i32 : i32, i32
  }
}

</mosaic_0001>

<bundles_post_ra>
// kernel: rgn_cell.1
= control target key start
LH: loop header
LB: loop body
LE: loop exit
PB: predicated region body
PF: predicated region fallthrough
CT: control target
= control target key end

     0   :  { %13 = vsyncpa [#allocation3], 0  ;;  %s841_s0 = inlined_call_operand.hbm [shape: f32[16,128], index: 0, kind: input, shape index: {}]   ;;  %s842_s1 = inlined_call_operand.hbm [shape: f32[16,256], index: 1, kind: input, shape index: {}]   ;;  %s843_s2 = inlined_call_operand.hbm [shape: f32[256,512], index: 2, kind: input, shape index: {}]   ;;  %s844_s3 = inlined_call_operand.vmem [shape: f32[1,128], index: 3, kind: input, shape index: {}]   ;;  %s845_s4 = inlined_call_operand.vmem [shape: f32[1,128], index: 4, kind: input, shape index: {}]   ;;  %s846_s5 = inlined_call_operand.vmem [shape: f32[1,128], index: 5, kind: input, shape index: {}]   ;;  %s847_s6 = inlined_call_operand.hbm [shape: f32[128,128], index: 6, kind: input, shape index: {}]   ;;  %s848_s7 = inlined_call_operand.vmem [shape: f32[1,128], index: 7, kind: input, shape index: {}]   ;;  %s849_s8 = inlined_call_operand.hbm [shape: f32[16,128], index: 8, kind: output, shape index: {}]  }
   0x1   :  { %14 = vsyncpa [#allocation6], 0 }
   0x2   :  { %15 = vsyncpa [#allocation9], 0 }
   0x3   :  { %16 = vsyncpa [#allocation4], 0  ;;  %s745_s27 = smov [#allocation5]  }
   0x4   :  { %s34_s28 = sshll.u32 %s745_s27, 4  ;;  %s35_s28 = int_to_ptr.vmem [resolvable:$true] %s34_s28 }
   0x5   :  { %s645_s29 = scalar_lea.vmem %s35_s28, 512  ;;  %p650_p1 = scmp.lt.s32.totalorder %s35_s28, %s35_s28 }
   0x6   :  { %p646_p0 = scmp.ne.s32.totalorder %s35_s28, %s645_s29  ;;  %p651_p2 = scmp.lt.s32.totalorder %s645_s29, %s645_s29 }
   0x8   :  { %p652_p3 = por %p651_p2, %p650_p1 }
   0xa   :  { %p653_p4 = pnand %p652_p3, %p646_p0 }
   0xc   :  { %656 = shalt.err (!%p653_p4)
}
   0xd   :  { %s746_s30 = smov 256   ;;  %s747_s9 = smov 16  }
   0xe   :  { %40 = dma.hbm_to_vmem [thread:$0]  %s842_s1, 512, %s35_s28, [#allocation6], %s746_s30, %s746_s30, %s747_s9  }
   0xf   :  { %s748_s12 = smov [#allocation2]  }
  0x10   :  { %s22_s13 = sshll.u32 %s748_s12, 4  ;;  %s23_s13 = int_to_ptr.vmem [resolvable:$true] %s22_s13 }
  0x11   :  { %s665_s14 = scalar_lea.vmem %s23_s13, 256  ;;  %p670_p6 = scmp.lt.s32.totalorder %s23_s13, %s23_s13 }
  0x12   :  { %p666_p5 = scmp.ne.s32.totalorder %s23_s13, %s665_s14  ;;  %p671_p7 = scmp.lt.s32.totalorder %s665_s14, %s665_s14 }
  0x14   :  { %p672_p8 = por %p671_p7, %p670_p6 }
  0x16   :  { %p673_p9 = pnand %p672_p8, %p666_p5 }
  0x18   :  { %676 = shalt.err (!%p673_p9)
}
  0x19   :  { %s749_s15 = smov 128   ;;  %s750_s16 = smov 8  }
  0x1a   :  { %28 = dma.hbm_to_vmem [thread:$0]  %s841_s0, 256, %s23_s13, [#allocation3], %s749_s15, %s749_s15, %s750_s16  }
  0x1b   :  { %s751_s1 = smov [#allocation7]  }
  0x1c   :  { %s46_s19 = sshll.u32 %s751_s1, 4  ;;  %s47_s19 = int_to_ptr.vmem [resolvable:$true] %s46_s19 }
  0x1d   :  { %s685_s20 = scalar_lea.vmem %s47_s19, 16384  ;;  %p690_p11 = scmp.lt.s32.totalorder %s47_s19, %s47_s19 }
  0x1e   :  { %p686_p10 = scmp.ne.s32.totalorder %s47_s19, %s685_s20  ;;  %p691_p12 = scmp.lt.s32.totalorder %s685_s20, %s685_s20 }
  0x20   :  { %p692_p13 = por %p691_p12, %p690_p11 }
  0x22   :  { %p693_p0 = pnand %p692_p13, %p686_p10 }
  0x24   :  { %696 = shalt.err (!%p693_p0)
}
  0x25   :  { %s752_s21 = smov 512   ;;  %s753_s22 = smov 32  }
  0x26   :  { %52 = dma.hbm_to_vmem [thread:$0]  %s843_s2, 16384, %s47_s19, [#allocation6], %s752_s21, %s752_s21, %s753_s22  }
  0x27   :  { %s754_s25 = smov [#allocation8]  }
  0x28   :  { %s64_s26 = sshll.u32 %s754_s25, 4  ;;  %s65_s26 = int_to_ptr.vmem [resolvable:$true] %s64_s26 }
  0x29   :  { %s705_s0 = scalar_lea.vmem %s65_s26, 2048  ;;  %p710_p2 = scmp.lt.s32.totalorder %s65_s26, %s65_s26 }
  0x2a   :  { %p706_p1 = scmp.ne.s32.totalorder %s65_s26, %s705_s0  ;;  %p711_p3 = scmp.lt.s32.totalorder %s705_s0, %s705_s0 }
  0x2c   :  { %p712_p4 = por %p711_p3, %p710_p2 }
  0x2e   :  { %p713_p5 = pnand %p712_p4, %p706_p1 }
  0x30   :  { %716 = shalt.err (!%p713_p5)
}
  0x31   :  { %70 = dma.hbm_to_vmem [thread:$0]  %s847_s6, 2048, %s65_s26, [#allocation9], %s749_s15, %s749_s15, %s750_s16  }
  0x32   :  { %737 = dma.done.wait [#allocation3], 256  }
  0x33   :  { %738 = vsyncadd [#allocation3], 4294967040 }
  0x34   :  { %739 = dma.done.wait [#allocation6], 16896  }
  0x35   :  { %740 = vsyncadd [#allocation6], 4294950400 }
  0x36   :  { %741 = dma.done.wait [#allocation9], 2048  }
  0x37   :  { %742 = vsyncadd [#allocation9], 4294965248  ;;  %v152_v0 = vld [vmem:[#allocation7 + $0x1e8] sm:$0xff]  ;;  %v151_v1 = vld [vmem:[#allocation7 + $0x1e0] sm:$0xff] }
  0x38   :  { %v148_v2 = vld [vmem:[#allocation7 + $0x1c8] sm:$0xff]  ;;  %219 = vmatprep.subr.mxu0 %v152_v0  ;;  %v147_v3 = vld [vmem:[#allocation7 + $0x1c0] sm:$0xff]  ;;  %v154_v10 = vld [vmem:[#allocation7 + $0x1f8] sm:$0xff] }
  0x39   :  { %220 = vmatpush1.msra.mxu0 %v151_v1  ;;  %v144_v4 = vld [vmem:[#allocation7 + $0x1a8] sm:$0xff]  ;;  %v143_v5 = vld [vmem:[#allocation7 + $0x1a0] sm:$0xff]  ;;  %v153_v11 = vld [vmem:[#allocation7 + $0x1f0] sm:$0xff]  ;;  %296 = vmatprep.subr.mxu1 %v154_v10 }
  0x3a   :  { %221 = vmatprep.subr.mxu0 %v148_v2  ;;  %v140_v6 = vld [vmem:[#allocation7 + $0x188] sm:$0xff]  ;;  %v139_v7 = vld [vmem:[#allocation7 + $0x180] sm:$0xff]  ;;  %v150_v13 = vld [vmem:[#allocation7 + $0x1d8] sm:$0xff]  ;;  %297 = vmatpush1.msra.mxu1 %v153_v11 }
  0x3b   :  { %222 = vmatpush1.msra.mxu0 %v147_v3  ;;  %v136_v8 = vld [vmem:[#allocation7 + $0x168] sm:$0xff]  ;;  %v135_v9 = vld [vmem:[#allocation7 + $0x160] sm:$0xff]  ;;  %v149_v15 = vld [vmem:[#allocation7 + $0x1d0] sm:$0xff]  ;;  %298 = vmatprep.subr.mxu1 %v150_v13 }
  0x3c   :  { %223 = vmatprep.subr.mxu0 %v144_v4  ;;  %v132_v12 = vld [vmem:[#allocation7 + $0x148] sm:$0xff]  ;;  %v131_v14 = vld [vmem:[#allocation7 + $0x140] sm:$0xff]  ;;  %v146_v16 = vld [vmem:[#allocation7 + $0x1b8] sm:$0xff]  ;;  %299 = vmatpush1.msra.mxu1 %v149_v15 }
  0x3d   :  { %224 = vmatpush1.msra.mxu0 %v143_v5  ;;  %v128_v17 = vld [vmem:[#allocation7 + $0x128] sm:$0xff]  ;;  %v145_v18 = vld [vmem:[#allocation7 + $0x1b0] sm:$0xff]  ;;  %v127_v19 = vld [vmem:[#allocation7 + $0x120] sm:$0xff]  ;;  %300 = vmatprep.subr.mxu1 %v146_v16 }
  0x3e   :  { %225 = vmatprep.subr.mxu0 %v140_v6  ;;  %v142_v20 = vld [vmem:[#allocation7 + $0x198] sm:$0xff]  ;;  %v124_v21 = vld [vmem:[#allocation7 + $0x108] sm:$0xff]  ;;  %v141_v22 = vld [vmem:[#allocation7 + $0x190] sm:$0xff]  ;;  %301 = vmatpush1.msra.mxu1 %v145_v18 }
  0x3f   :  { %226 = vmatpush1.msra.mxu0 %v139_v7  ;;  %v123_v23 = vld [vmem:[#allocation7 + $0x100] sm:$0xff]  ;;  %v138_v24 = vld [vmem:[#allocation7 + $0x178] sm:$0xff]  ;;  %v120_v25 = vld [vmem:[#allocation7 + $0xe8] sm:$0xff]  ;;  %302 = vmatprep.subr.mxu1 %v142_v20 }
  0x40   :  { %227 = vmatprep.subr.mxu0 %v136_v8  ;;  %v137_v26 = vld [vmem:[#allocation7 + $0x170] sm:$0xff]  ;;  %v119_v27 = vld [vmem:[#allocation7 + $0xe0] sm:$0xff]  ;;  %303 = vmatpush1.msra.mxu1 %v141_v22  ;;  %v134_v28 = vld [vmem:[#allocation7 + $0x158] sm:$0xff] }
  0x41   :  { %228 = vmatpush1.msra.mxu0 %v135_v9  ;;  %v116_v29 = vld [vmem:[#allocation7 + $0xc8] sm:$0xff]  ;;  %304 = vmatprep.subr.mxu1 %v138_v24  ;;  %v133_v30 = vld [vmem:[#allocation7 + $0x150] sm:$0xff]  ;;  %v115_v31 = vld [vmem:[#allocation7 + $0xc0] sm:$0xff] }
  0x42   :  { %229 = vmatprep.subr.mxu0 %v132_v12  ;;  %305 = vmatpush1.msra.mxu1 %v137_v26  ;;  %v130_v32 = vld [vmem:[#allocation7 + $0x138] sm:$0xff]  ;;  %v112_v33 = vld [vmem:[#allocation7 + $0xa8] sm:$0xff]  ;;  %v129_v34 = vld [vmem:[#allocation7 + $0x130] sm:$0xff] }
  0x43   :  { %230 = vmatpush1.msra.mxu0 %v131_v14  ;;  %306 = vmatprep.subr.mxu1 %v134_v28  ;;  %v111_v35 = vld [vmem:[#allocation7 + $0xa0] sm:$0xff]  ;;  %v126_v36 = vld [vmem:[#allocation7 + $0x118] sm:$0xff]  ;;  %v108_v37 = vld [vmem:[#allocation7 + $0x88] sm:$0xff] }
  0x44   :  { %231 = vmatprep.subr.mxu0 %v128_v17  ;;  %307 = vmatpush1.msra.mxu1 %v133_v30  ;;  %v125_v38 = vld [vmem:[#allocation7 + $0x110] sm:$0xff]  ;;  %v107_v39 = vld [vmem:[#allocation7 + $0x80] sm:$0xff]  ;;  %v122_v40 = vld [vmem:[#allocation7 + $0xf8] sm:$0xff] }
  0x45   :  { %232 = vmatpush1.msra.mxu0 %v127_v19  ;;  %308 = vmatprep.subr.mxu1 %v130_v32  ;;  %v104_v41 = vld [vmem:[#allocation7 + $0x68] sm:$0xff]  ;;  %v121_v42 = vld [vmem:[#allocation7 + $0xf0] sm:$0xff]  ;;  %v103_v43 = vld [vmem:[#allocation7 + $0x60] sm:$0xff] }
  0x46   :  { %233 = vmatprep.subr.mxu0 %v124_v21  ;;  %309 = vmatpush1.msra.mxu1 %v129_v34  ;;  %v118_v44 = vld [vmem:[#allocation7 + $0xd8] sm:$0xff]  ;;  %v100_v45 = vld [vmem:[#allocation7 + $0x48] sm:$0xff]  ;;  %v117_v46 = vld [vmem:[#allocation7 + $0xd0] sm:$0xff] }
  0x47   :  { %234 = vmatpush1.msra.mxu0 %v123_v23  ;;  %310 = vmatprep.subr.mxu1 %v126_v36  ;;  %v99_v47 = vld [vmem:[#allocation7 + $0x40] sm:$0xff]  ;;  %v114_v48 = vld [vmem:[#allocation7 + $0xb8] sm:$0xff]  ;;  %v96_v49 = vld [vmem:[#allocation7 + $0x28] sm:$0xff] }
  0x48   :  { %235 = vmatprep.subr.mxu0 %v120_v25  ;;  %311 = vmatpush1.msra.mxu1 %v125_v38  ;;  %v113_v50 = vld [vmem:[#allocation7 + $0xb0] sm:$0xff]  ;;  %v95_v51 = vld [vmem:[#allocation7 + $0x20] sm:$0xff]  ;;  %v110_v52 = vld [vmem:[#allocation7 + $0x98] sm:$0xff] }
  0x49   :  { %236 = vmatpush1.msra.mxu0 %v119_v27  ;;  %312 = vmatprep.subr.mxu1 %v122_v40  ;;  %v92_v53 = vld [vmem:[#allocation7 + $0x8] sm:$0xff]  ;;  %v109_v54 = vld [vmem:[#allocation7 + $0x90] sm:$0xff]  ;;  %v91_v55 = vld [vmem:[#allocation7] sm:$0xff] }
  0x4a   :  { %237 = vmatprep.subr.mxu0 %v116_v29  ;;  %313 = vmatpush1.msra.mxu1 %v121_v42  ;;  %v106_v56 = vld [vmem:[#allocation7 + $0x78] sm:$0xff]  ;;  %v216_v57 = vld [vmem:[#allocation7 + $0x3e8] sm:$0xff]  ;;  %v105_v58 = vld [vmem:[#allocation7 + $0x70] sm:$0xff] }
  0x4b   :  { %238 = vmatpush1.msra.mxu0 %v115_v31  ;;  %314 = vmatprep.subr.mxu1 %v118_v44  ;;  %v215_v59 = vld [vmem:[#allocation7 + $0x3e0] sm:$0xff]  ;;  %v102_v60 = vld [vmem:[#allocation7 + $0x58] sm:$0xff]  ;;  %v212_v61 = vld [vmem:[#allocation7 + $0x3c8] sm:$0xff] }
  0x4c   :  { %239 = vmatprep.subr.mxu0 %v112_v33  ;;  %315 = vmatpush1.msra.mxu1 %v117_v46  ;;  %v101_v62 = vld [vmem:[#allocation7 + $0x50] sm:$0xff]  ;;  %v211_v63 = vld [vmem:[#allocation7 + $0x3c0] sm:$0xff]  ;;  %v98_v0 = vld [vmem:[#allocation7 + $0x38] sm:$0xff] }
  0x4d   :  { %240 = vmatpush1.msra.mxu0 %v111_v35  ;;  %316 = vmatprep.subr.mxu1 %v114_v48  ;;  %v208_v1 = vld [vmem:[#allocation7 + $0x3a8] sm:$0xff]  ;;  %v97_v2 = vld [vmem:[#allocation7 + $0x30] sm:$0xff]  ;;  %v207_v3 = vld [vmem:[#allocation7 + $0x3a0] sm:$0xff] }
  0x4e   :  { %241 = vmatprep.subr.mxu0 %v108_v37  ;;  %317 = vmatpush1.msra.mxu1 %v113_v50  ;;  %v94_v4 = vld [vmem:[#allocation7 + $0x18] sm:$0xff]  ;;  %v204_v5 = vld [vmem:[#allocation7 + $0x388] sm:$0xff]  ;;  %v93_v6 = vld [vmem:[#allocation7 + $0x10] sm:$0xff] }
  0x4f   :  { %242 = vmatpush1.msra.mxu0 %v107_v39  ;;  %318 = vmatprep.subr.mxu1 %v110_v52  ;;  %v203_v7 = vld [vmem:[#allocation7 + $0x380] sm:$0xff]  ;;  %v218_v8 = vld [vmem:[#allocation7 + $0x3f8] sm:$0xff]  ;;  %v200_v9 = vld [vmem:[#allocation7 + $0x368] sm:$0xff] }
  0x50   :  { %243 = vmatprep.subr.mxu0 %v104_v41  ;;  %319 = vmatpush1.msra.mxu1 %v109_v54  ;;  %v217_v10 = vld [vmem:[#allocation7 + $0x3f0] sm:$0xff]  ;;  %v199_v11 = vld [vmem:[#allocation7 + $0x360] sm:$0xff]  ;;  %v214_v12 = vld [vmem:[#allocation7 + $0x3d8] sm:$0xff] }
  0x51   :  { %244 = vmatpush1.msra.mxu0 %v103_v43  ;;  %320 = vmatprep.subr.mxu1 %v106_v56  ;;  %v196_v13 = vld [vmem:[#allocation7 + $0x348] sm:$0xff]  ;;  %v213_v14 = vld [vmem:[#allocation7 + $0x3d0] sm:$0xff]  ;;  %v195_v15 = vld [vmem:[#allocation7 + $0x340] sm:$0xff] }
  0x52   :  { %245 = vmatprep.subr.mxu0 %v100_v45  ;;  %321 = vmatpush1.msra.mxu1 %v105_v58  ;;  %v210_v16 = vld [vmem:[#allocation7 + $0x3b8] sm:$0xff]  ;;  %v192_v17 = vld [vmem:[#allocation7 + $0x328] sm:$0xff]  ;;  %v209_v18 = vld [vmem:[#allocation7 + $0x3b0] sm:$0xff] }
  0x53   :  { %246 = vmatpush1.msra.mxu0 %v99_v47  ;;  %322 = vmatprep.subr.mxu1 %v102_v60  ;;  %v191_v19 = vld [vmem:[#allocation7 + $0x320] sm:$0xff]  ;;  %v206_v20 = vld [vmem:[#allocation7 + $0x398] sm:$0xff]  ;;  %v188_v21 = vld [vmem:[#allocation7 + $0x308] sm:$0xff] }
  0x54   :  { %247 = vmatprep.subr.mxu0 %v96_v49  ;;  %323 = vmatpush1.msra.mxu1 %v101_v62  ;;  %v205_v22 = vld [vmem:[#allocation7 + $0x390] sm:$0xff]  ;;  %v187_v23 = vld [vmem:[#allocation7 + $0x300] sm:$0xff]  ;;  %v202_v24 = vld [vmem:[#allocation7 + $0x378] sm:$0xff] }
  0x55   :  { %248 = vmatpush1.msra.mxu0 %v95_v51  ;;  %324 = vmatprep.subr.mxu1 %v98_v0  ;;  %v184_v25 = vld [vmem:[#allocation7 + $0x2e8] sm:$0xff]  ;;  %v201_v26 = vld [vmem:[#allocation7 + $0x370] sm:$0xff]  ;;  %v183_v27 = vld [vmem:[#allocation7 + $0x2e0] sm:$0xff] }
  0x56   :  { %249 = vmatprep.subr.mxu0 %v92_v53  ;;  %325 = vmatpush1.msra.mxu1 %v97_v2  ;;  %v198_v28 = vld [vmem:[#allocation7 + $0x358] sm:$0xff]  ;;  %v180_v29 = vld [vmem:[#allocation7 + $0x2c8] sm:$0xff]  ;;  %v179_v31 = vld [vmem:[#allocation7 + $0x2c0] sm:$0xff] }
  0x57   :  { %250 = vmatpush1.msra.mxu0 %v91_v55  ;;  %326 = vmatprep.subr.mxu1 %v94_v4  ;;  %v819_v30 = vld [vmem:[#allocation5 + $0x8] sm:$0xff]  ;;  %v197_v32 = vld [vmem:[#allocation7 + $0x350] sm:$0xff]  ;;  %v194_v34 = vld [vmem:[#allocation7 + $0x338] sm:$0xff] }
  0x58   :  { %251 = vmatprep.subr.mxu0 %v216_v57  ;;  %327 = vmatpush1.msra.mxu1 %v93_v6  ;;  %v176_v33 = vld [vmem:[#allocation7 + $0x2a8] sm:$0xff]  ;;  %v175_v35 = vld [vmem:[#allocation7 + $0x2a0] sm:$0xff]  ;;  %v193_v36 = vld [vmem:[#allocation7 + $0x330] sm:$0xff] }
  0x59   :  { %252 = vmatpush2.msra.mxu0 %v215_v59  ;;  %328 = vmatprep.subr.mxu1 %v218_v8  ;;  %v172_v37 = vld [vmem:[#allocation7 + $0x288] sm:$0xff]  ;;  %v190_v38 = vld [vmem:[#allocation7 + $0x318] sm:$0xff]  ;;  %v171_v39 = vld [vmem:[#allocation7 + $0x280] sm:$0xff] }
  0x5a   :  { %253 = vmatprep.subr.mxu0 %v212_v61  ;;  %329 = vmatpush2.msra.mxu1 %v217_v10  ;;  %v189_v40 = vld [vmem:[#allocation7 + $0x310] sm:$0xff]  ;;  %v168_v41 = vld [vmem:[#allocation7 + $0x268] sm:$0xff]  ;;  %v186_v42 = vld [vmem:[#allocation7 + $0x2f8] sm:$0xff] }
  0x5b   :  { %254 = vmatpush2.msra.mxu0 %v211_v63  ;;  %330 = vmatprep.subr.mxu1 %v214_v12  ;;  %v167_v43 = vld [vmem:[#allocation7 + $0x260] sm:$0xff]  ;;  %v185_v44 = vld [vmem:[#allocation7 + $0x2f0] sm:$0xff]  ;;  %v164_v45 = vld [vmem:[#allocation7 + $0x248] sm:$0xff] }
  0x5c   :  { %255 = vmatprep.subr.mxu0 %v208_v1  ;;  %331 = vmatpush2.msra.mxu1 %v213_v14  ;;  %v182_v46 = vld [vmem:[#allocation7 + $0x2d8] sm:$0xff]  ;;  %v163_v47 = vld [vmem:[#allocation7 + $0x240] sm:$0xff]  ;;  %v181_v48 = vld [vmem:[#allocation7 + $0x2d0] sm:$0xff] }
  0x5d   :  { %256 = vmatpush2.msra.mxu0 %v207_v3  ;;  %332 = vmatprep.subr.mxu1 %v210_v16  ;;  %v160_v49 = vld [vmem:[#allocation7 + $0x228] sm:$0xff]  ;;  %v178_v50 = vld [vmem:[#allocation7 + $0x2b8] sm:$0xff]  ;;  %v159_v51 = vld [vmem:[#allocation7 + $0x220] sm:$0xff] }
  0x5e   :  { %257 = vmatprep.subr.mxu0 %v204_v5  ;;  %333 = vmatpush2.msra.mxu1 %v209_v18  ;;  %v177_v52 = vld [vmem:[#allocation7 + $0x2b0] sm:$0xff]  ;;  %v156_v53 = vld [vmem:[#allocation7 + $0x208] sm:$0xff]  ;;  %v174_v54 = vld [vmem:[#allocation7 + $0x298] sm:$0xff] }
  0x5f   :  { %258 = vmatpush2.msra.mxu0 %v203_v7  ;;  %334 = vmatprep.subr.mxu1 %v206_v20  ;;  %v155_v55 = vld [vmem:[#allocation7 + $0x200] sm:$0xff]  ;;  %v173_v56 = vld [vmem:[#allocation7 + $0x290] sm:$0xff]  ;;  %v170_v58 = vld [vmem:[#allocation7 + $0x278] sm:$0xff] }
  0x60   :  { %259 = vmatprep.subr.mxu0 %v200_v9  ;;  %335 = vmatpush2.msra.mxu1 %v205_v22  ;;  %v87_v57 = vld [vmem:[#allocation5] sm:$0xff]  ;;  %v90_v59 = vld [vmem:[#allocation5 + $0x18] sm:$0xff]  ;;  %v169_v60 = vld [vmem:[#allocation7 + $0x270] sm:$0xff] }
  0x61   :  { %260 = vmatpush2.msra.mxu0 %v199_v11  ;;  %336 = vmatprep.subr.mxu1 %v202_v24  ;;  %v166_v61 = vld [vmem:[#allocation7 + $0x258] sm:$0xff]  ;;  %v165_v62 = vld [vmem:[#allocation7 + $0x250] sm:$0xff]  ;;  %v415_v6 = vld [vmem:[#allocation8 + $0x68] sm:$0xff] }
  0x62   :  { %261 = vmatprep.subr.mxu0 %v196_v13  ;;  %337 = vmatpush2.msra.mxu1 %v201_v26  ;;  %v417_v63 = vld [vmem:[#allocation8 + $0x78] sm:$0xff]  ;;  %v89_v0 = vld [vmem:[#allocation5 + $0x10] sm:$0xff]  ;;  %v414_v7 = vld [vmem:[#allocation8 + $0x60] sm:$0xff] }
  0x63   :  { %262 = vmatpush2.msra.mxu0 %v195_v15  ;;  %338 = vmatprep.subr.mxu1 %v198_v28  ;;  %v162_v1 = vld [vmem:[#allocation7 + $0x238] sm:$0xff]  ;;  %v161_v2 = vld [vmem:[#allocation7 + $0x230] sm:$0xff]  ;;  %v411_v10 = vld [vmem:[#allocation8 + $0x48] sm:$0xff] }
  0x64   :  { %263 = vmatprep.subr.mxu0 %v192_v17  ;;  %283 = vmatprep.mubr.f32.mxu0 %v819_v30  ;;  %v158_v3 = vld [vmem:[#allocation7 + $0x218] sm:$0xff]  ;;  %v416_v4 = vld [vmem:[#allocation8 + $0x70] sm:$0xff]  ;;  %v410_v11 = vld [vmem:[#allocation8 + $0x40] sm:$0xff] }
  0x65   :  { %264 = vmatpush2.msra.mxu0 %v191_v19  ;;  %339 = vmatpush2.msra.mxu1 %v197_v32  ;;  %v157_v5 = vld [vmem:[#allocation7 + $0x210] sm:$0xff]  ;;  %v413_v8 = vld [vmem:[#allocation8 + $0x58] sm:$0xff]  ;;  %v407_v14 = vld [vmem:[#allocation8 + $0x28] sm:$0xff] }
  0x66   :  { %265 = vmatprep.subr.mxu0 %v188_v21  ;;  %340 = vmatprep.subr.mxu1 %v194_v34  ;;  %v412_v9 = vld [vmem:[#allocation8 + $0x50] sm:$0xff]  ;;  %v409_v12 = vld [vmem:[#allocation8 + $0x38] sm:$0xff]  ;;  %v406_v15 = vld [vmem:[#allocation8 + $0x20] sm:$0xff] }
  0x67   :  { %266 = vmatpush2.msra.mxu0 %v187_v23  ;;  %341 = vmatpush2.msra.mxu1 %v193_v36  ;;  %v408_v13 = vld [vmem:[#allocation8 + $0x30] sm:$0xff]  ;;  %v405_v16 = vld [vmem:[#allocation8 + $0x18] sm:$0xff]  ;;  %v403_v18 = vld [vmem:[#allocation8 + $0x8] sm:$0xff] }
  0x68   :  { %267 = vmatprep.subr.mxu0 %v184_v25  ;;  %342 = vmatprep.subr.mxu1 %v190_v38  ;;  %v404_v17 = vld [vmem:[#allocation8 + $0x10] sm:$0xff]  ;;  %v402_v19 = vld [vmem:[#allocation8] sm:$0xff] }
  0x69   :  { %268 = vmatpush2.msra.mxu0 %v183_v27  ;;  %343 = vmatpush2.msra.mxu1 %v189_v40  ;;  %v551_v20 = vld [vmem:[%s844_s3] ss:$0 sm:$0xff] }
  0x6a   :  { %269 = vmatprep.subr.mxu0 %v180_v29  ;;  %344 = vmatprep.subr.mxu1 %v186_v42  ;;  %v552_v29 = vld [vmem:[%s845_s4] ss:$0 sm:$0xff] }
  0x6b   :  { %270 = vmatpush2.msra.mxu0 %v179_v31  ;;  %345 = vmatpush2.msra.mxu1 %v185_v44  ;;  %v553_v36 = vld [vmem:[%s846_s5] ss:$0 sm:$0xff]  ;;  %s755_s5 = smov [#allocation10]  }
  0x6c   :  { %271 = vmatprep.subr.mxu0 %v176_v33  ;;  %346 = vmatprep.subr.mxu1 %v182_v46  ;;  %v554_v44 = vld [vmem:[%s848_s7] ss:$0 sm:$0xff]  ;;  %s537_s7 = sshll.u32 %s755_s5, 4  ;;  %s538_s7 = int_to_ptr.vmem [resolvable:$true] %s537_s7 }
  0x6d   :  { %272 = vmatpush2.msra.mxu0 %v175_v35  ;;  %347 = vmatpush2.msra.mxu1 %v181_v48  ;;  %s717_s11 = scalar_lea.vmem %s538_s7, 256  ;;  %p722_p7 = scmp.lt.s32.totalorder %s538_s7, %s538_s7 }
  0x6e   :  { %273 = vmatprep.subr.mxu0 %v172_v37  ;;  %348 = vmatprep.subr.mxu1 %v178_v50  ;;  %p718_p6 = scmp.ne.s32.totalorder %s538_s7, %s717_s11  ;;  %p723_p8 = scmp.lt.s32.totalorder %s717_s11, %s717_s11 }
  0x6f   :  { %274 = vmatpush2.msra.mxu0 %v171_v39  ;;  %349 = vmatpush2.msra.mxu1 %v177_v52  ;;  %v86_v52 = vld [vmem:[#allocation2 + $0x8] sm:$0xff] }
  0x70   :  { %275 = vmatprep.subr.mxu0 %v168_v41  ;;  %350 = vmatprep.subr.mxu1 %v174_v54  ;;  %p724_p9 = por %p723_p8, %p722_p7 }
  0x71   :  { %276 = vmatpush2.msra.mxu0 %v167_v43  ;;  %351 = vmatpush2.msra.mxu1 %v173_v56 }
  0x72   :  { %277 = vmatprep.subr.mxu0 %v164_v45  ;;  %352 = vmatprep.subr.mxu1 %v170_v58  ;;  %p725_p10 = pnand %p724_p9, %p718_p6 }
  0x73   :  { %278 = vmatpush2.msra.mxu0 %v163_v47  ;;  %353 = vmatpush2.msra.mxu1 %v169_v60 }
  0x74   :  { %279 = vmatprep.subr.mxu0 %v160_v49  ;;  %354 = vmatprep.subr.mxu1 %v166_v61 }
  0x75   :  { %280 = vmatpush2.msra.mxu0 %v159_v51  ;;  %360 = vmatprep.mubr.f32.mxu1 %v819_v30 }
  0x76   :  { %281 = vmatprep.subr.mxu0 %v156_v53  ;;  %355 = vmatpush2.msra.mxu1 %v165_v62 }
  0x77   :  { %282 = vmatpush2.msra.mxu0 %v155_v55  ;;  %356 = vmatprep.subr.mxu1 %v162_v1  ;;  %v85_v55 = vld [vmem:[#allocation2] sm:$0xff] }
  0x78   :  { %284 = vmatmul.mubr.f32.vlgmr.msra.gmra.mxu0 %v87_v57  ;;  %575 = vmatprep.subr.mxu0 %v417_v63 }
  0x79   :  { %289 = vmatprep.mubr.f32.mxu0 %v90_v59  ;;  %357 = vmatpush2.msra.mxu1 %v161_v2 }
  0x7a   :  { %576 = vmatpush3.msra.mxu0 %v417_v63  ;;  %358 = vmatprep.subr.mxu1 %v158_v3 }
  0x7b   :  { %577 = vmatprep.subr.mxu0 %v416_v4  ;;  %359 = vmatpush2.msra.mxu1 %v157_v5 }
  0x7c   :  { %290 = vmatmul.mubr.f32.gmra.mxu0 %v89_v0  ;;  %361 = vmatmul.mubr.f32.vlgmr.msra.gmra.mxu1 %v87_v57 }
  0x7d   :  { %578 = vmatpush3.msra.mxu0 %v416_v4  ;;  %366 = vmatprep.mubr.f32.mxu1 %v90_v59 }
  0x7e   :  { %579 = vmatprep.subr.mxu0 %v415_v6 }
  0x7f   :  { %580 = vmatpush3.msra.mxu0 %v415_v6 }
  0x80   :  { %581 = vmatprep.subr.mxu0 %v414_v7  ;;  %367 = vmatmul.mubr.f32.gmra.mxu1 %v89_v0 }
  0x81   :  { %582 = vmatpush3.msra.mxu0 %v414_v7 }
  0x82   :  { %583 = vmatprep.subr.mxu0 %v413_v8 }
  0x83   :  { %584 = vmatpush3.msra.mxu0 %v413_v8 }
  0x84   :  { %585 = vmatprep.subr.mxu0 %v412_v9 }
  0x85   :  { %586 = vmatpush3.msra.mxu0 %v412_v9 }
  0x86   :  { %587 = vmatprep.subr.mxu0 %v411_v10 }
  0x87   :  { %588 = vmatpush3.msra.mxu0 %v411_v10 }
  0x88   :  { %589 = vmatprep.subr.mxu0 %v410_v11 }
  0x89   :  { %590 = vmatpush3.msra.mxu0 %v410_v11 }
  0x8a   :  { %591 = vmatprep.subr.mxu0 %v409_v12 }
  0x8b   :  { %592 = vmatpush3.msra.mxu0 %v409_v12 }
  0x8c   :  { %593 = vmatprep.subr.mxu0 %v408_v13 }
  0x8d   :  { %594 = vmatpush3.msra.mxu0 %v408_v13 }
  0x8e   :  { %595 = vmatprep.subr.mxu0 %v407_v14 }
  0x8f   :  { %596 = vmatpush3.msra.mxu0 %v407_v14 }
  0x90   :  { %597 = vmatprep.subr.mxu0 %v406_v15 }
  0x91   :  { %598 = vmatpush3.msra.mxu0 %v406_v15 }
  0x92   :  { %599 = vmatprep.subr.mxu0 %v405_v16 }
  0x93   :  { %600 = vmatpush3.msra.mxu0 %v405_v16 }
  0x94   :  { %601 = vmatprep.subr.mxu0 %v404_v17 }
  0x95   :  { %602 = vmatpush3.msra.mxu0 %v404_v17 }
  0x96   :  { %603 = vmatprep.subr.mxu0 %v403_v18 }
  0x97   :  { %604 = vmatpush3.msra.mxu0 %v403_v18 }
  0x98   :  { %605 = vmatprep.subr.mxu0 %v402_v19 }
  0x99   :  { %606 = vmatpush3.msra.mxu0 %v402_v19 }
 0x138   :  { %v285_v21 = vpop.f32.mrf.mxu0 }
 0x139   :  { %v380_v22 = vadd.f32 %v551_v20, %v285_v21 }
 0x13a   :  { %v287_v23 = vpop.f32.mrf.mxu0 }
 0x13b   :  { %v400_v24 = vmax.f32 %v380_v22, 0.0  ;;  %v389_v31 = vadd.f32 %v552_v29, %v287_v23 }
 0x13c   :  { %v291_v25 = vpop.f32.mrf.mxu0  ;;  %v362_v34 = vpop.f32.mrf.mxu1 }
 0x13d   :  { %v381_v26 = vadd.f32 %v551_v20, %v291_v25  ;;  %607 = vmatprep.mubr.f32.mxu0 %v400_v24  ;;  %v555_v33 = vmul.f32 -1.442695, %v389_v31  ;;  %v398_v40 = vadd.f32 %v553_v36, %v362_v34 }
 0x13e   :  { %v293_v28 = vpop.f32.mrf.mxu0  ;;  %v364_v35 = vpop.f32.mrf.mxu1 }
 0x13f   :  { %v401_v27 = vmax.f32 %v381_v26, 0.0  ;;  %v390_v30 = vadd.f32 %v552_v29, %v293_v28  ;;  %v524_v2 = vmax.f32 %v364_v35, 0.0 }
 0x140   :  { %v368_v37 = vpop.f32.mrf.mxu1 }
 0x141   :  { %608 = vmatmul.mubr.f32.vlgmr.msra.gmra.mxu0 %v401_v27  ;;  %v556_v32 = vmul.f32 -1.442695, %v390_v30  ;;  %v399_v41 = vadd.f32 %v553_v36, %v368_v37 }
 0x142   :  { %v370_v59 = vpop.f32.mrf.mxu1 }
 0x143   :  { %621 = vpow2.f32 %v556_v32  ;;  %v525_v0 = vmax.f32 %v370_v59, 0.0 }
 0x144   :  { %623 = vpow2.f32 %v555_v33 }
 0x145   :  { %625 = vtanh.f32 %v398_v40 }
 0x146   :  { %627 = vtanh.f32 %v399_v41 }
 0x150   :  { %v622_v38 = vpop.eup %621 }
 0x151   :  { %v624_v39 = vpop.eup %623  ;;  %v511_v42 = vadd.f32 1.0, %v622_v38 }
 0x152   :  { %v510_v43 = vadd.f32 1.0, %v624_v39  ;;  %v626_v49 = vpop.eup %625 }
 0x153   :  { %629 = vrcp.f32 %v511_v42  ;;  %v628_v50 = vpop.eup %627 }
 0x154   :  { %631 = vrcp.f32 %v510_v43 }
 0x160   :  { %v630_v51 = vpop.eup %629 }
 0x161   :  { %v632_v53 = vpop.eup %631  ;;  %v519_v57 = vmul.f32 %v630_v51, %v628_v50 }
 0x162   :  { %v518_v62 = vmul.f32 %v632_v53, %v626_v49 }
 0x201   :  { %v609_v45 = vpop.f32.mrf.mxu0 }
 0x202   :  { %v497_v46 = vadd.f32 %v609_v45, %v554_v44 }
 0x203   :  { %v491_v47 = vpop.f32.mrf.mxu0 }
 0x204   :  { %633 = vtanh.f32 %v497_v46  ;;  %v492_v48 = vadd.f32 %v554_v44, %v491_v47 }
 0x206   :  { %635 = vtanh.f32 %v492_v48 }
 0x211   :  { %v634_v54 = vpop.eup %633 }
 0x212   :  { %v503_v56 = vmul.f32 %v634_v54, %v86_v52 }
 0x213   :  { %v636_v58 = vpop.eup %635 }
 0x214   :  { %v521_v60 = vadd.f32 %v519_v57, %v503_v56  ;;  %v502_v61 = vmul.f32 %v636_v58, %v85_v55 }
 0x216   :  { %v523_v63 = vmax.f32 %v521_v60, 0.0  ;;  %v520_v1 = vadd.f32 %v518_v62, %v502_v61 }
 0x218   :  { %v527_v3 = vadd.f32 %v525_v0, %v523_v63  ;;  %v522_v4 = vmax.f32 %v520_v1, 0.0 }
 0x21a   :  { %v529_v5 = vmax.f32 %v527_v3, 0.0  ;;  %v526_v6 = vadd.f32 %v524_v2, %v522_v4 }
 0x21c   :  { %531 = vst [vmem:[#allocation10 + $0x8] sm:$0xff] %v529_v5  ;;  %v528_v7 = vmax.f32 %v526_v6, 0.0 }
 0x21e   :  { %530 = vst [vmem:[#allocation10] sm:$0xff] %v528_v7 }
 0x21f   :  { %728 = shalt.err (!%p725_p10)
}
 0x220   :  { %543 = dma.vmem_to_hbm [thread:$0]  %s538_s7, 256, %s849_s8, [#allocation4], %s749_s15, %s749_s15, %s750_s16  }
 0x221   :  { %743 = dma.done.wait [#allocation4], 256  }
 0x222   :  { %744 = vsyncadd [#allocation4], 4294967040 }
 0x223   :  { %547 = vsyncpa [#allocation3], 1 }
 0x224   :  { %548 = vsyncpa [#allocation6], 1 }
 0x225   :  { %549 = vsyncpa [#allocation9], 1 }
 0x226   :  { %550 = vsyncpa [#allocation4], 1 }

</bundles_post_ra>
